<compile_context>
chip_gen: v5e
topology: v5e:2x2
jax: 0.10.0
libtpu: 0.0.40
codegen_flags: <defaults>
</compile_context>

<pallas_src>
import functools

import jax
import jax.numpy as jnp
from jax import lax
from jax.experimental import pallas as pl
from jax.experimental.pallas import tpu as pltpu


# ----------------------------------------------------------------------------
# Tiling heuristics
# ----------------------------------------------------------------------------
def _default_target_block_bytes() -> int:
    """Per-grid-step input-block byte target, chip-aware.

    v7x-class chips (<=64 MiB VMEM, ~3.2 TB/s HBM) need ~4 MiB blocks so the
    ~0.35 us/step overhead stops costing ~1 MB of lost bandwidth per step;
    v5e/v6e (128 MiB VMEM, 0.8-1.4 TB/s HBM) hit >85% of roofline at ~2 MiB
    while keeping double-buffered VMEM small.
    """
    try:
        info = pltpu.get_tpu_info()
        vmem = int(getattr(info, "vmem_capacity_bytes", 128 << 20))
    except Exception:
        vmem = 128 << 20
    return (4 << 20) if vmem <= (64 << 20) else (2 << 20)


def _choose_tiling(B, C, Cout, HW, in_isz, out_isz, target_bytes,
                   io_budget_bytes, chunk):
    """Pick (Bt, TS): per-step blocks are (Bt, C, TS) in / (Bt, Cout, TS) out.

    Grow TS up to the full spatial extent first, then block batch rows, while
    keeping 2*(in_block + out_block) (double-buffered) under io_budget_bytes.
    If the spatial extent is larger than the budget, TS is a multiple of
    `chunk` lanes and the grid uses cdiv (ragged last block) — no full-extent
    fallback that could blow VMEM or collapse the pipeline to one step.
    """
    in_per_lane = C * in_isz
    io_per_lane = C * in_isz + Cout * out_isz
    lane_budget_tgt = max(chunk, target_bytes // max(1, in_per_lane))
    lane_budget_vmem = max(128, (io_budget_bytes // 2) // max(1, io_per_lane))
    lanes = min(lane_budget_tgt, lane_budget_vmem)

    if HW <= lanes:
        ts = HW                                   # full spatial extent per row
        row_in = HW * in_per_lane
        row_io = HW * io_per_lane
        bt = min(B,
                 max(1, target_bytes // max(1, row_in)),
                 max(1, (io_budget_bytes // 2) // max(1, row_io)))
    else:
        if lanes >= chunk:
            ts = (lanes // chunk) * chunk         # multiple of the lane chunk
        else:
            ts = max(128, (lanes // 128) * 128)   # still lane-aligned
        bt = 1
    return int(bt), int(ts)


# ----------------------------------------------------------------------------
# Pallas kernel: 1x1 conv / channel mix on an NCHW tensor (demo cond_preproc)
# ----------------------------------------------------------------------------
def _static_or_dyn_loop(n, body, unroll_limit=8):
    """Static unroll for short trip counts (LLO visibility), scf.for otherwise."""
    if n <= unroll_limit:
        for i in range(n):
            body(i)
    else:
        pl.loop(0, n)(body)


def _make_conv1x1_kernel(Bt, C, Cout, TS, chunk, use_vpu, mxu_dtype):
    n_full = TS // chunk if TS >= chunk else 0
    rem = TS - n_full * chunk

    def kernel(x_ref, w_ref, b_ref, o_ref):
        # x_ref: (Bt, C,    TS)  spatial tile on the 128-lane axis
        # w_ref: (Cout, C)       tiny weight block, resident every step
        # b_ref: (Cout, 1)       bias, broadcast along lanes
        # o_ref: (Bt, Cout, TS)
        w = w_ref[...].astype(jnp.float32)        # (Cout, C)
        b = b_ref[...].astype(jnp.float32)        # (Cout, 1)
        # Hoisted bias broadcasts (JAX doesn't CSE broadcast_in_dim in loops).
        b_chunk = jnp.broadcast_to(b, (Cout, chunk)) if n_full else None
        b_rem = jnp.broadcast_to(b, (Cout, rem)) if rem else None
        w_mxu = None if use_vpu else w.astype(mxu_dtype)

        def mix(bt, start, size, bias_full):
            # Sub-chunk: <= `chunk` lanes live at once -> ~8-16 vregs, no spill.
            x = x_ref[pl.ds(bt, 1), :, pl.ds(start, size)][0]   # (C, size)
            if use_vpu:
                # Unrolled VPU broadcast-FMA over the lane-wide spatial axis.
                # With C, Cout <= 64 the MXU would run at low utilization and
                # only add push/pop latency on an HBM-bound op.
                xf = x.astype(jnp.float32)
                acc = bias_full + w[:, 0:1] * xf[0:1, :]
                for c in range(1, C):
                    acc = acc + w[:, c:c + 1] * xf[c:c + 1, :]
            else:
                # MXU path with f32 accumulation: (Cout, C) @ (C, size).
                acc = lax.dot_general(
                    w_mxu, x.astype(mxu_dtype),
                    dimension_numbers=(((1,), (0,)), ((), ())),
                    preferred_element_type=jnp.float32) + bias_full
            o_ref[pl.ds(bt, 1), :, pl.ds(start, size)] = (
                acc.astype(o_ref.dtype).reshape(1, Cout, size))

        def row(bt):
            if n_full:
                def chunk_body(ck):
                    s = pl.multiple_of(ck * chunk, 128)
                    mix(bt, s, chunk, b_chunk)
                _static_or_dyn_loop(n_full, chunk_body)
            if rem:
                mix(bt, n_full * chunk, rem, b_rem)

        _static_or_dyn_loop(Bt, row)

    return kernel


def pallas_conv1x1_nchw(x_nchw, w, b, *, out_dtype=None, force_mxu=False,
                        target_block_bytes=None, chunk_lanes=512,
                        core_parallel=False, input_buffers=2):
    """1x1 conv (per-pixel channel mix) on an NCHW tensor as a Pallas kernel.

    w: (Cout, Cin)  — PyTorch Conv2d weight with the 1x1 kernel dims squeezed.
    b: (Cout,)

    Keeps NCHW end-to-end: x is viewed as (B, Cin, H*W) so H*W sits on the
    128-lane axis (both reshapes are free last-dim splits/merges, no relayout)
    and the output stores are lane-dense.
    """
    B, C, H, W = x_nchw.shape
    Cout = w.shape[0]
    assert w.shape == (Cout, C) and b.shape == (Cout,)
    assert chunk_lanes % 128 == 0 and chunk_lanes >= 128
    HW = H * W
    out_dtype = x_nchw.dtype if out_dtype is None else out_dtype
    in_isz = jnp.dtype(x_nchw.dtype).itemsize
    out_isz = jnp.dtype(out_dtype).itemsize

    if target_block_bytes is None:
        target_block_bytes = _default_target_block_bytes()
    io_budget_bytes = 24 << 20   # 2*(in+out) double-buffered cap (fits v7x 32 MiB scoped)

    Bt, TS = _choose_tiling(B, C, Cout, HW, in_isz, out_isz,
                            target_block_bytes, io_budget_bytes, chunk_lanes)
    grid = (pl.cdiv(B, Bt), pl.cdiv(HW, TS))

    x3 = x_nchw.reshape(B, C, HW)   # free reshape, NCHW preserved
    b2 = b.reshape(Cout, 1)

    use_vpu = (not force_mxu) and (max(C, Cout) <= 64)
    mxu_dtype = jnp.bfloat16 if x_nchw.dtype == jnp.bfloat16 else jnp.float32
    kernel = _make_conv1x1_kernel(Bt, C, Cout, TS, chunk_lanes, use_vpu, mxu_dtype)

    # Explicit VMEM limit: covers the double-buffered I/O blocks + weights,
    # generous margin, and stays well under v7x's 64 MiB physical VMEM.
    n_in_buf = max(2, int(input_buffers))
    need = (n_in_buf * Bt * C * TS * in_isz
            + 2 * Bt * Cout * TS * out_isz
            + 2 * Cout * (C + 1) * jnp.dtype(w.dtype).itemsize)
    vmem_limit = int(min(max(need + (8 << 20), 20 << 20), 40 << 20))

    if core_parallel:
        # v7x: shard the leading (batch-block) grid axis across both TCs.
        dims = (pltpu.CORE_PARALLEL, pltpu.ARBITRARY)
    else:
        dims = ("parallel", "parallel")

    x_spec_kwargs = {}
    if n_in_buf > 2:
        x_spec_kwargs = dict(pipeline_mode=pl.Buffered(n_in_buf))

    cost = pl.CostEstimate(
        flops=2 * B * HW * C * Cout,
        transcendentals=0,
        bytes_accessed=(B * HW * (C * in_isz + Cout * out_isz)
                        + Cout * (C + 1) * jnp.dtype(w.dtype).itemsize))

    out3 = pl.pallas_call(
        kernel,
        out_shape=jax.ShapeDtypeStruct((B, Cout, HW), out_dtype),
        grid_spec=pltpu.PrefetchScalarGridSpec(
            num_scalar_prefetch=0,
            grid=grid,
            in_specs=[
                pl.BlockSpec((Bt, C, TS), lambda bi, si: (bi, 0, si),
                             **x_spec_kwargs),
                pl.BlockSpec((Cout, C), lambda bi, si: (0, 0)),
                pl.BlockSpec((Cout, 1), lambda bi, si: (0, 0)),
            ],
            out_specs=pl.BlockSpec((Bt, Cout, TS), lambda bi, si: (bi, 0, si)),
        ),
        compiler_params=pltpu.CompilerParams(
            dimension_semantics=dims,
            vmem_limit_bytes=vmem_limit),
        cost_estimate=cost,
    )(x3, w, b2)
    return out3.reshape(B, Cout, H, W)


# ----------------------------------------------------------------------------
# Module equivalent
# ----------------------------------------------------------------------------
class CatCondAsList:
    """JAX equivalent of the PyTorch CatCondAsList module (pure glue)."""

    def __init__(self, cond_preproc=None, cond_is_list=False):
        self.cond_preproc = cond_preproc
        self.cond_is_list = cond_is_list

    def __call__(self, x, cond):
        if self.cond_preproc is not None:
            cond_processed = self.cond_preproc(cond)
        else:
            # True no-op, exactly like the PyTorch reference: no copy kernel,
            # no HBM round trip.
            cond_processed = cond
        if self.cond_is_list:
            return [x] + list(cond_processed)
        else:
            return [x, cond_processed]
        # NOTE: Python list construction is host-side glue — no device compute.


# ----------------------------------------------------------------------------
# Demo / correctness check
# ----------------------------------------------------------------------------
if __name__ == "__main__":
    key = jax.random.PRNGKey(0)
    kx, kc, kw, kb, kc2, kc3, kc4 = jax.random.split(key, 7)

    B, C, H, W = 2, 4, 16, 16
    Cout = 8
    x = jax.random.normal(kx, (B, C, H, W), dtype=jnp.float32)
    cond = jax.random.normal(kc, (B, C, H, W), dtype=jnp.float32)

    def ref_conv(c, wgt, bias):
        return jnp.einsum("bchw,oc->bohw", c, wgt) + bias[None, :, None, None]

    # ---- case 1: default module (cond_preproc=None) -> identity is a no-op --
    mod_default = CatCondAsList(cond_preproc=None, cond_is_list=False)
    out1 = mod_default(x, cond)
    jax.block_until_ready(out1)
    assert len(out1) == 2
    assert out1[0] is x            # passed through untouched
    assert out1[1] is cond         # no copy kernel, zero HBM traffic

    # ---- case 2: Pallas cond_preproc (VPU broadcast-FMA path) ---------------
    w = jax.random.normal(kw, (Cout, C), dtype=jnp.float32) * 0.1
    b = jax.random.normal(kb, (Cout,), dtype=jnp.float32) * 0.1
    preproc = functools.partial(pallas_conv1x1_nchw, w=w, b=b)
    mod_pre = CatCondAsList(cond_preproc=preproc, cond_is_list=False)
    out2 = mod_pre(x, cond)
    jax.block_until_ready(out2)
    ref = ref_conv(cond, w, b)
    assert out2[0].shape == (B, C, H, W)
    assert out2[1].shape == (B, Cout, H, W)
    assert jnp.allclose(out2[1], ref, atol=1e-5, rtol=1e-5)

    # ---- case 2b: batch blocking + in-kernel dynamic row loop ---------------
    cond16 = jax.random.normal(kc2, (16, C, H, W), dtype=jnp.float32)
    out16 = pallas_conv1x1_nchw(cond16, w=w, b=b)
    jax.block_until_ready(out16)
    ref16 = ref_conv(cond16, w, b)
    assert jnp.allclose(out16, ref16, atol=1e-5, rtol=1e-5)

    # ---- case 2c: MXU fallback path + chunked spatial accumulator -----------
    cond_big = jax.random.normal(kc3, (1, C, 64, 64), dtype=jnp.float32)
    out_mxu = pallas_conv1x1_nchw(cond_big, w=w, b=b, force_mxu=True)
    jax.block_until_ready(out_mxu)
    ref_big = ref_conv(cond_big, w, b)
    assert out_mxu.shape == (1, Cout, 64, 64)
    assert jnp.allclose(out_mxu, ref_big, atol=1e-5, rtol=1e-5)

    # ---- case 2d: cdiv spatial tiling with a ragged last grid block ---------
    cond_rag = jax.random.normal(kc4, (1, C, 36, 36), dtype=jnp.float32)
    out_rag = pallas_conv1x1_nchw(cond_rag, w=w, b=b, target_block_bytes=8 << 10)
    jax.block_until_ready(out_rag)
    ref_rag = ref_conv(cond_rag, w, b)
    assert jnp.allclose(out_rag, ref_rag, atol=1e-5, rtol=1e-5)

    # ---- case 2e: narrow output dtype (memory-bound op -> less write traffic)
    out_bf16 = pallas_conv1x1_nchw(cond, w=w, b=b, out_dtype=jnp.bfloat16)
    jax.block_until_ready(out_bf16)
    assert out_bf16.dtype == jnp.bfloat16
    assert jnp.allclose(out_bf16.astype(jnp.float32), ref, atol=2e-2, rtol=2e-2)

    # ---- case 2f: v7x dual-TC grid sharding (guarded; optional per-chip) ----
    try:
        out_cp = pallas_conv1x1_nchw(cond16, w=w, b=b,
                                     target_block_bytes=8 << 10,
                                     core_parallel=True)
        jax.block_until_ready(out_cp)
        assert jnp.allclose(out_cp, ref16, atol=1e-5, rtol=1e-5)
    except Exception:
        pass   # CORE_PARALLEL not supported / not beneficial on this chip.

    # ---- case 3: cond_is_list=True with a list-valued condition -------------
    mod_list = CatCondAsList(cond_preproc=None, cond_is_list=True)
    out3 = mod_list(x, [cond, cond * 2.0])
    jax.block_until_ready(out3)
    assert len(out3) == 3
    assert out3[1] is cond
    assert jnp.allclose(out3[2], cond * 2.0)

    print("KERNEL_OK")
</pallas_src>

<mosaic_0001>
module attributes {stable_mosaic.version = 11 : i64} {
  func.func @kernel(%arg0: i32, %arg1: i32, %arg2: memref<2x4x256xf32, #tpu.memory_space<vmem>>, %arg3: memref<8x4xf32, #tpu.memory_space<vmem>>, %arg4: memref<8x1xf32, #tpu.memory_space<vmem>>, %arg5: memref<2x8x256xf32, #tpu.memory_space<vmem>>) attributes {dimension_semantics = [#tpu.dimension_semantics<parallel>, #tpu.dimension_semantics<parallel>], iteration_bounds = array<i64: 1, 1>, scalar_prefetch = 0 : i64, scratch_operands = 0 : i64, tpu.core_type = #tpu.core_type<tc>, window_params = [{transform_indices = @transform_0, window_bounds = array<i64: 2, 4, 256>}, {pipeline_mode = #tpu.pipeline_mode<synchronous>, transform_indices = @transform_1, window_bounds = array<i64: 8, 4>}, {pipeline_mode = #tpu.pipeline_mode<synchronous>, transform_indices = @transform_2, window_bounds = array<i64: 8, 1>}, {transform_indices = @transform_3, window_bounds = array<i64: 2, 8, 256>}]} {
    %c0 = arith.constant 0 : index
    %c0_0 = arith.constant 0 : index
    %0 = vector.load %arg3[%c0, %c0_0] : memref<8x4xf32, #tpu.memory_space<vmem>>, vector<8x4xf32>
    %c0_1 = arith.constant 0 : index
    %c0_2 = arith.constant 0 : index
    %1 = vector.load %arg4[%c0_1, %c0_2] : memref<8x1xf32, #tpu.memory_space<vmem>>, vector<8x1xf32>
    %2 = vector.shape_cast %1 : vector<8x1xf32> to vector<8x1xf32>
    %3 = vector.broadcast %2 : vector<8x1xf32> to vector<8x256xf32>
    %c0_3 = arith.constant 0 : index
    %c0_4 = arith.constant 0 : index
    %c0_5 = arith.constant 0 : index
    %4 = vector.load %arg2[%c0_3, %c0_4, %c0_5] : memref<2x4x256xf32, #tpu.memory_space<vmem>>, vector<1x4x256xf32>
    %5 = vector.shape_cast %4 : vector<1x4x256xf32> to vector<4x256xf32>
    %6 = vector.extract_strided_slice %0 {offsets = [0, 0], sizes = [8, 1], strides = [1, 1]} : vector<8x4xf32> to vector<8x1xf32>
    %7 = vector.extract_strided_slice %5 {offsets = [0, 0], sizes = [1, 256], strides = [1, 1]} : vector<4x256xf32> to vector<1x256xf32>
    %8 = vector.broadcast %6 : vector<8x1xf32> to vector<8x256xf32>
    %9 = vector.broadcast %7 : vector<1x256xf32> to vector<8x256xf32>
    %10 = arith.mulf %8, %9 : vector<8x256xf32>
    %11 = arith.addf %3, %10 : vector<8x256xf32>
    %12 = vector.extract_strided_slice %0 {offsets = [0, 1], sizes = [8, 1], strides = [1, 1]} : vector<8x4xf32> to vector<8x1xf32>
    %13 = vector.extract_strided_slice %5 {offsets = [1, 0], sizes = [1, 256], strides = [1, 1]} : vector<4x256xf32> to vector<1x256xf32>
    %14 = vector.broadcast %12 : vector<8x1xf32> to vector<8x256xf32>
    %15 = vector.broadcast %13 : vector<1x256xf32> to vector<8x256xf32>
    %16 = arith.mulf %14, %15 : vector<8x256xf32>
    %17 = arith.addf %11, %16 : vector<8x256xf32>
    %18 = vector.extract_strided_slice %0 {offsets = [0, 2], sizes = [8, 1], strides = [1, 1]} : vector<8x4xf32> to vector<8x1xf32>
    %19 = vector.extract_strided_slice %5 {offsets = [2, 0], sizes = [1, 256], strides = [1, 1]} : vector<4x256xf32> to vector<1x256xf32>
    %20 = vector.broadcast %18 : vector<8x1xf32> to vector<8x256xf32>
    %21 = vector.broadcast %19 : vector<1x256xf32> to vector<8x256xf32>
    %22 = arith.mulf %20, %21 : vector<8x256xf32>
    %23 = arith.addf %17, %22 : vector<8x256xf32>
    %24 = vector.extract_strided_slice %0 {offsets = [0, 3], sizes = [8, 1], strides = [1, 1]} : vector<8x4xf32> to vector<8x1xf32>
    %25 = vector.extract_strided_slice %5 {offsets = [3, 0], sizes = [1, 256], strides = [1, 1]} : vector<4x256xf32> to vector<1x256xf32>
    %26 = vector.broadcast %24 : vector<8x1xf32> to vector<8x256xf32>
    %27 = vector.broadcast %25 : vector<1x256xf32> to vector<8x256xf32>
    %28 = arith.mulf %26, %27 : vector<8x256xf32>
    %29 = arith.addf %23, %28 : vector<8x256xf32>
    %30 = vector.shape_cast %29 : vector<8x256xf32> to vector<1x8x256xf32>
    %c0_6 = arith.constant 0 : index
    %c0_7 = arith.constant 0 : index
    %c0_8 = arith.constant 0 : index
    %31 = vector.load %arg5[%c0_6, %c0_7, %c0_8] : memref<2x8x256xf32, #tpu.memory_space<vmem>>, vector<1x8x256xf32>
    tpu.vector_store %arg5[%c0_6, %c0_7, %c0_8], %30 {strides = array<i32>} : memref<2x8x256xf32, #tpu.memory_space<vmem>>, vector<1x8x256xf32>,
    %c1 = arith.constant 1 : index
    %c0_9 = arith.constant 0 : index
    %c0_10 = arith.constant 0 : index
    %32 = vector.load %arg2[%c1, %c0_9, %c0_10] : memref<2x4x256xf32, #tpu.memory_space<vmem>>, vector<1x4x256xf32>
    %33 = vector.shape_cast %32 : vector<1x4x256xf32> to vector<4x256xf32>
    %34 = vector.extract_strided_slice %0 {offsets = [0, 0], sizes = [8, 1], strides = [1, 1]} : vector<8x4xf32> to vector<8x1xf32>
    %35 = vector.extract_strided_slice %33 {offsets = [0, 0], sizes = [1, 256], strides = [1, 1]} : vector<4x256xf32> to vector<1x256xf32>
    %36 = vector.broadcast %34 : vector<8x1xf32> to vector<8x256xf32>
    %37 = vector.broadcast %35 : vector<1x256xf32> to vector<8x256xf32>
    %38 = arith.mulf %36, %37 : vector<8x256xf32>
    %39 = arith.addf %3, %38 : vector<8x256xf32>
    %40 = vector.extract_strided_slice %0 {offsets = [0, 1], sizes = [8, 1], strides = [1, 1]} : vector<8x4xf32> to vector<8x1xf32>
    %41 = vector.extract_strided_slice %33 {offsets = [1, 0], sizes = [1, 256], strides = [1, 1]} : vector<4x256xf32> to vector<1x256xf32>
    %42 = vector.broadcast %40 : vector<8x1xf32> to vector<8x256xf32>
    %43 = vector.broadcast %41 : vector<1x256xf32> to vector<8x256xf32>
    %44 = arith.mulf %42, %43 : vector<8x256xf32>
    %45 = arith.addf %39, %44 : vector<8x256xf32>
    %46 = vector.extract_strided_slice %0 {offsets = [0, 2], sizes = [8, 1], strides = [1, 1]} : vector<8x4xf32> to vector<8x1xf32>
    %47 = vector.extract_strided_slice %33 {offsets = [2, 0], sizes = [1, 256], strides = [1, 1]} : vector<4x256xf32> to vector<1x256xf32>
    %48 = vector.broadcast %46 : vector<8x1xf32> to vector<8x256xf32>
    %49 = vector.broadcast %47 : vector<1x256xf32> to vector<8x256xf32>
    %50 = arith.mulf %48, %49 : vector<8x256xf32>
    %51 = arith.addf %45, %50 : vector<8x256xf32>
    %52 = vector.extract_strided_slice %0 {offsets = [0, 3], sizes = [8, 1], strides = [1, 1]} : vector<8x4xf32> to vector<8x1xf32>
    %53 = vector.extract_strided_slice %33 {offsets = [3, 0], sizes = [1, 256], strides = [1, 1]} : vector<4x256xf32> to vector<1x256xf32>
    %54 = vector.broadcast %52 : vector<8x1xf32> to vector<8x256xf32>
    %55 = vector.broadcast %53 : vector<1x256xf32> to vector<8x256xf32>
    %56 = arith.mulf %54, %55 : vector<8x256xf32>
    %57 = arith.addf %51, %56 : vector<8x256xf32>
    %58 = vector.shape_cast %57 : vector<8x256xf32> to vector<1x8x256xf32>
    %c1_11 = arith.constant 1 : index
    %c0_12 = arith.constant 0 : index
    %c0_13 = arith.constant 0 : index
    %59 = vector.load %arg5[%c1_11, %c0_12, %c0_13] : memref<2x8x256xf32, #tpu.memory_space<vmem>>, vector<1x8x256xf32>
    tpu.vector_store %arg5[%c1_11, %c0_12, %c0_13], %58 {strides = array<i32>} : memref<2x8x256xf32, #tpu.memory_space<vmem>>, vector<1x8x256xf32>,
    return
  }
  func.func @transform_0(%arg0: i32, %arg1: i32) -> (i32, i32, i32) {
    %c0_i32 = arith.constant 0 : i32
    %c0_i32_0 = arith.constant 0 : i32
    return %arg0, %c0_i32, %arg1 : i32, i32, i32
  }
  func.func @transform_1(%arg0: i32, %arg1: i32) -> (i32, i32) {
    %c0_i32 = arith.constant 0 : i32
    %c0_i32_0 = arith.constant 0 : i32
    %c0_i32_1 = arith.constant 0 : i32
    return %c0_i32, %c0_i32_0 : i32, i32
  }
  func.func @transform_2(%arg0: i32, %arg1: i32) -> (i32, i32) {
    %c0_i32 = arith.constant 0 : i32
    %c0_i32_0 = arith.constant 0 : i32
    %c0_i32_1 = arith.constant 0 : i32
    return %c0_i32, %c0_i32_0 : i32, i32
  }
  func.func @transform_3(%arg0: i32, %arg1: i32) -> (i32, i32, i32) {
    %c0_i32 = arith.constant 0 : i32
    %c0_i32_0 = arith.constant 0 : i32
    return %arg0, %c0_i32, %arg1 : i32, i32, i32
  }
}

</mosaic_0001>

<bundles_post_ra>
// kernel: tpu_custom_call.1
= control target key start
LH: loop header
LB: loop body
LE: loop exit
PB: predicated region body
PF: predicated region fallthrough
CT: control target
= control target key end

     0   :  { %v186_v1 = vmov 0   ;;  %v187_v2 = vmov 1   ;;  %s228_s0 = inlined_call_operand.vmem [shape: f32[2,4,256], index: 0, kind: input, shape index: {}]   ;;  %s229_s1 = inlined_call_operand.vmem [shape: f32[8,4], index: 1, kind: input, shape index: {}]   ;;  %s230_s2 = inlined_call_operand.vmem [shape: f32[8,1], index: 2, kind: input, shape index: {}]   ;;  %s231_s3 = inlined_call_operand.hbm [shape: f32[2,8,256], index: 3, kind: output, shape index: {}]  }
   0x1   :  { %v15_v0 = vld [vmem:[%s229_s1] sm:$0xff]  ;;  %155 = vset.pattern.permute.xlu0 %v186_v1  ;;  %156 = vset.pattern.permute.xlu1 %v187_v2 }
   0x2   :  { %8 = vsyncpa [#allocation3], 0  ;;  %25 = vperm.xlu0 %155, %v15_v0   ;;  %40 = vperm.xlu1 %156, %v15_v0   ;;  %v188_v3 = vmov 3   ;;  %v16_v4 = vld [vmem:[%s230_s2] sm:$0xff]  ;;  %v189_v5 = vmov 2   ;;  %v147_v7 = vld [vmem:[%s228_s0 + $0x8] sm:$0xff] }
   0x3   :  { %158 = vset.pattern.permute.xlu2 %v188_v3  ;;  %v22_v6 = vld [vmem:[%s228_s0] sm:$0xff]  ;;  %v116_v10 = vperm.slane %v147_v7, 3  ;;  %v86_v13 = vperm.slane %v147_v7, 0  ;;  %v87_v14 = vperm.slane %v147_v7, 4  ;;  %v96_v18 = vperm.slane %v147_v7, 1  ;;  %s190_s0 = smov [#allocation2]  }
   0x4   :  { %68 = vperm.xlu2 %158, %v15_v0   ;;  %v71_v8 = vperm.slane %v22_v6, 3  ;;  %v72_v9 = vperm.slane %v22_v6, 7  ;;  %v29_v11 = vperm.slane %v22_v6, 0  ;;  %v30_v12 = vperm.slane %v22_v6, 4  ;;  %s133_s2 = sshll.u32 %s190_s0, 4  ;;  %s135_s21 = sshll.u32 %s231_s3, 4  ;;  %s134_s2 = int_to_ptr.vmem [resolvable:$true] %s133_s2  ;;  %s136_s21 = int_to_ptr.hbm [resolvable:$true] %s135_s21 }
   0x5   :  { %v43_v16 = vperm.slane %v22_v6, 1  ;;  %v44_v17 = vperm.slane %v22_v6, 5  ;;  %v97_v19 = vperm.slane %v147_v7, 5  ;;  %v57_v21 = vperm.slane %v22_v6, 2  ;;  %s191_s22 = smov 256   ;;  %s192_s23 = smov 16  }
   0x6   :  { %v58_v22 = vperm.slane %v22_v6, 6  ;;  %v106_v23 = vperm.slane %v147_v7, 2  ;;  %v107_v24 = vperm.slane %v147_v7, 6  ;;  %v75_v25 = vperm.slane %v71_v8, 3 }
   0x7   :  { %v76_v26 = vperm.slane %v72_v9, 3  ;;  %v117_v27 = vperm.slane %v147_v7, 7  ;;  %v120_v28 = vperm.slane %v116_v10, 3  ;;  %v33_v29 = vperm.slane %v29_v11, 0 }
   0x8   :  { %v34_v30 = vperm.slane %v30_v12, 0  ;;  %v90_v31 = vperm.slane %v86_v13, 0  ;;  %v91_v32 = vperm.slane %v87_v14, 0  ;;  %v47_v34 = vperm.slane %v43_v16, 1 }
   0x9   :  { %v48_v35 = vperm.slane %v44_v17, 1  ;;  %v100_v36 = vperm.slane %v96_v18, 1  ;;  %v101_v37 = vperm.slane %v97_v19, 1  ;;  %v61_v38 = vperm.slane %v57_v21, 2 }
   0xa   :  { %19 = vperm.xlu0 %155, %v16_v4   ;;  %157 = vset.pattern.permute.xlu1 %v189_v5  ;;  %v62_v39 = vperm.slane %v58_v22, 2  ;;  %v110_v40 = vperm.slane %v106_v23, 2  ;;  %v111_v41 = vperm.slane %v107_v24, 2  ;;  %v121_v42 = vperm.slane %v117_v27, 3 }
   0xb   :  { %54 = vperm.xlu1 %157, %v15_v0  }
  0x12   :  { %159 = vset.pattern.permute.xlu0 %v188_v3 }
  0x5e   :  { %v69_v33 = vpop.permute.xlu2 %68 }
  0x5f   :  { %v77_v43 = vmul.f32 %v75_v25, %v69_v33  ;;  %v78_v44 = vmul.f32 %v76_v26, %v69_v33  ;;  %v122_v45 = vmul.f32 %v120_v28, %v69_v33  ;;  %v123_v4 = vmul.f32 %v121_v42, %v69_v33 }
  0x74   :  { %v26_v15 = vpop.permute.xlu0 %25  ;;  %v41_v20 = vpop.permute.xlu1 %40 }
  0x75   :  { %v35_v46 = vmul.f32 %v33_v29, %v26_v15  ;;  %v36_v47 = vmul.f32 %v34_v30, %v26_v15  ;;  %v92_v48 = vmul.f32 %v90_v31, %v26_v15  ;;  %v93_v49 = vmul.f32 %v91_v32, %v26_v15 }
  0x76   :  { %v49_v50 = vmul.f32 %v47_v34, %v41_v20  ;;  %v50_v51 = vmul.f32 %v48_v35, %v41_v20  ;;  %v102_v52 = vmul.f32 %v100_v36, %v41_v20  ;;  %v103_v53 = vmul.f32 %v101_v37, %v41_v20 }
  0x7c   :  { %v20_v54 = vpop.permute.xlu0 %19 }
  0x7d   :  { %v37_v55 = vadd.f32 %v35_v46, %v20_v54  ;;  %v38_v56 = vadd.f32 %v36_v47, %v20_v54  ;;  %v94_v57 = vadd.f32 %v92_v48, %v20_v54  ;;  %v95_v58 = vadd.f32 %v93_v49, %v20_v54  ;;  %v55_v59 = vpop.permute.xlu1 %54 }
  0x7e   :  { %v63_v60 = vmul.f32 %v61_v38, %v55_v59  ;;  %v64_v61 = vmul.f32 %v62_v39, %v55_v59  ;;  %v112_v62 = vmul.f32 %v110_v40, %v55_v59  ;;  %v113_v63 = vmul.f32 %v111_v41, %v55_v59 }
  0x7f   :  { %v51_v0 = vadd.f32 %v49_v50, %v37_v55  ;;  %v52_v1 = vadd.f32 %v50_v51, %v38_v56  ;;  %v104_v2 = vadd.f32 %v102_v52, %v94_v57  ;;  %v105_v3 = vadd.f32 %v103_v53, %v95_v58 }
  0x81   :  { %v65_v5 = vadd.f32 %v63_v60, %v51_v0  ;;  %v66_v6 = vadd.f32 %v64_v61, %v52_v1  ;;  %v114_v7 = vadd.f32 %v112_v62, %v104_v2  ;;  %v115_v8 = vadd.f32 %v113_v63, %v105_v3 }
  0x83   :  { %v79_v9 = vadd.f32 %v77_v43, %v65_v5  ;;  %v80_v10 = vadd.f32 %v78_v44, %v66_v6  ;;  %v124_v11 = vadd.f32 %v122_v45, %v114_v7  ;;  %v125_v12 = vadd.f32 %v123_v4, %v115_v8 }
  0x85   :  { %81 = vst [vmem:[#allocation2] sm:$0xff] %v79_v9 }
  0x86   :  { %82 = vst [vmem:[#allocation2 + $0x8] sm:$0xff] %v80_v10 }
  0x87   :  { %127 = vst [vmem:[#allocation2 + $0x10] sm:$0xff] %v124_v11 }
  0x88   :  { %128 = vst [vmem:[#allocation2 + $0x18] sm:$0xff] %v125_v12 }
  0x89   :  { %141 = dma.vmem_to_hbm [thread:$0]  %s134_s2, 512, %s136_s21, [#allocation3], %s191_s22, %s191_s22, %s192_s23  }
  0x8a   :  { %184 = dma.done.wait [#allocation3], 512  }
  0x8b   :  { %185 = vsyncadd [#allocation3], 4294966784 }
  0x8c   :  { %146 = vsyncpa [#allocation3], 1 }

</bundles_post_ra>
